<compile_context>
chip_gen: v7x
topology: tpu7x:2x2x1
jax: 0.10.0
libtpu: 0.0.40
codegen_flags: <defaults>
</compile_context>

<pallas_src>
import jax
import jax.numpy as jnp
from jax.experimental import pallas as pl
from jax.experimental.pallas import tpu as pltpu


def _round_up(x, m):
    return ((x + m - 1) // m) * m


def softq_kernel(s_ref, a_ref, w1s_ref, w1a_ref, b1_ref, w2_ref, b2_ref,
                 w3_ref, b3_ref, o_ref):
    # Layer 1: split matmul replaces torch.cat([state, action], 1) @ W1.
    h1 = (jnp.dot(s_ref[...], w1s_ref[...], preferred_element_type=jnp.float32)
          + jnp.dot(a_ref[...], w1a_ref[...], preferred_element_type=jnp.float32)
          + b1_ref[...])
    h1 = jnp.maximum(h1, 0.0)

    # Layer 2: bf16 inputs -> full-rate MXU, f32 accumulate.
    h2 = jnp.dot(h1.astype(jnp.bfloat16), w2_ref[...],
                 preferred_element_type=jnp.float32) + b2_ref[...]
    h2 = jnp.maximum(h2, 0.0)

    # Layer 3 (256 -> 1): VPU multiply + XLU lane reduce (frees the MXU slot,
    # avoids a width-1 masked store).  Output block is lane-dense (TB, 128);
    # the wrapper keeps only column 0.
    q = jnp.sum(h2 * w3_ref[...].astype(jnp.float32), axis=-1, keepdims=True)
    q = q + b3_ref[...]                      # (TB, 1) + (1, 1) broadcast
    o_ref[...] = jnp.broadcast_to(q, o_ref.shape)


def soft_q_forward(state, action, params):
    """state: (B, state_dim), action: (B, action_dim) -> (B, 1) float32."""
    w1s, w1a, b1, w2, b2, w3, b3 = params
    B, state_dim = state.shape
    action_dim = action.shape[1]
    hidden = w2.shape[0]

    # Batch tile: 256 rows (one 256x256 MXU pass on layer 2 for v6e/v7x, two
    # 128-row tiles on v5e), rounded down for tiny batches (multiple of 8).
    TB = min(256, _round_up(max(B, 1), 8))
    Bp = _round_up(B, TB)

    s = state.astype(jnp.bfloat16)
    a = action.astype(jnp.bfloat16)
    if Bp != B:
        s = jnp.pad(s, ((0, Bp - B), (0, 0)))
        a = jnp.pad(a, ((0, Bp - B), (0, 0)))

    def resident(shape):
        # Weight/bias blocks: constant block index -> stay resident in VMEM
        # across all batch tiles (no re-DMA).
        return pl.BlockSpec(shape, lambda i: (0, 0))

    out = pl.pallas_call(
        softq_kernel,
        out_shape=jax.ShapeDtypeStruct((Bp, 128), jnp.float32),
        grid=(pl.cdiv(Bp, TB),),
        in_specs=[
            pl.BlockSpec((TB, state_dim), lambda i: (i, 0)),
            pl.BlockSpec((TB, action_dim), lambda i: (i, 0)),
            resident((state_dim, hidden)),
            resident((action_dim, hidden)),
            resident((1, hidden)),
            resident((hidden, hidden)),
            resident((1, hidden)),
            resident((1, hidden)),
            resident((1, 1)),
        ],
        out_specs=pl.BlockSpec((TB, 128), lambda i: (i, 0)),
        compiler_params=pltpu.CompilerParams(
            dimension_semantics=("parallel",)),
    )(s, a, w1s, w1a, b1, w2, b2, w3, b3)

    return out[:B, :1]


def init_soft_q_params(key, state_dim, action_dim, hidden=256, edge=0.003):
    """Mirrors PyTorch nn.Linear default init + the edge init on linear3.

    Weights are bf16 (full-rate MXU, half DMA bytes); biases stay f32.
    w1 is split into state / action halves so no host-side concat is needed.
    """
    in_dim = state_dim + action_dim
    k1, k2, k3, k4, k5, k6 = jax.random.split(key, 6)

    def uni(k, shape, bound):
        return jax.random.uniform(k, shape, jnp.float32, minval=-bound, maxval=bound)

    bound1 = 1.0 / float(in_dim) ** 0.5
    bound2 = 1.0 / float(hidden) ** 0.5

    w1 = uni(k1, (in_dim, hidden), bound1)
    w1s = w1[:state_dim].astype(jnp.bfloat16)
    w1a = w1[state_dim:].astype(jnp.bfloat16)
    b1 = uni(k2, (1, hidden), bound1)
    w2 = uni(k3, (hidden, hidden), bound2).astype(jnp.bfloat16)
    b2 = uni(k4, (1, hidden), bound2)
    w3 = uni(k5, (1, hidden), edge).astype(jnp.bfloat16)   # linear3.weight row
    b3 = uni(k6, (1, 1), edge)                             # linear3.bias
    return (w1s, w1a, b1, w2, b2, w3, b3)


def soft_q_reference(state, action, params):
    """Pure-JAX reference with the same dtypes/casts as the kernel."""
    w1s, w1a, b1, w2, b2, w3, b3 = params
    s = state.astype(jnp.bfloat16)
    a = action.astype(jnp.bfloat16)
    h1 = jnp.maximum(
        jnp.dot(s, w1s, preferred_element_type=jnp.float32)
        + jnp.dot(a, w1a, preferred_element_type=jnp.float32) + b1, 0.0)
    h2 = jnp.maximum(
        jnp.dot(h1.astype(jnp.bfloat16), w2, preferred_element_type=jnp.float32)
        + b2, 0.0)
    return jnp.sum(h2 * w3.astype(jnp.float32), axis=-1, keepdims=True) + b3


if __name__ == "__main__":
    key = jax.random.PRNGKey(0)
    k_state, k_action, k_params = jax.random.split(key, 3)

    batch, state_dim, action_dim = 4, 24, 8
    state = jax.random.normal(k_state, (batch, state_dim), jnp.float32)
    action = jax.random.normal(k_action, (batch, action_dim), jnp.float32)
    params = init_soft_q_params(k_params, state_dim, action_dim)

    q = soft_q_forward(state, action, params)
    q = jax.block_until_ready(q)

    q_ref = soft_q_reference(state, action, params)
    assert q.shape == (batch, 1), q.shape
    assert jnp.allclose(q, q_ref, atol=1e-3, rtol=1e-3), (q, q_ref)

    # TODO(synk): the REDQ ensemble (N critics) could be fused into one kernel
    # with a (B, N) lane-dense output; this implements the single SoftQNet
    # module as specified.

    print("KERNEL_OK")
</pallas_src>

<mosaic_0001>
module attributes {stable_mosaic.version = 11 : i64} {
  func.func @softq_kernel(%arg0: i32, %arg1: memref<8x24xbf16, #tpu.memory_space<vmem>>, %arg2: memref<8x8xbf16, #tpu.memory_space<vmem>>, %arg3: memref<24x256xbf16, #tpu.memory_space<vmem>>, %arg4: memref<8x256xbf16, #tpu.memory_space<vmem>>, %arg5: memref<1x256xf32, #tpu.memory_space<vmem>>, %arg6: memref<256x256xbf16, #tpu.memory_space<vmem>>, %arg7: memref<1x256xf32, #tpu.memory_space<vmem>>, %arg8: memref<1x256xbf16, #tpu.memory_space<vmem>>, %arg9: memref<1x1xf32, #tpu.memory_space<vmem>>, %arg10: memref<8x128xf32, #tpu.memory_space<vmem>>) attributes {dimension_semantics = [#tpu.dimension_semantics<parallel>], iteration_bounds = array<i64: 1>, scalar_prefetch = 0 : i64, scratch_operands = 0 : i64, tpu.core_type = #tpu.core_type<tc>, window_params = [{transform_indices = @transform_0, window_bounds = array<i64: 8, 24>}, {transform_indices = @transform_1, window_bounds = array<i64: 8, 8>}, {pipeline_mode = #tpu.pipeline_mode<synchronous>, transform_indices = @transform_2, window_bounds = array<i64: 24, 256>}, {pipeline_mode = #tpu.pipeline_mode<synchronous>, transform_indices = @transform_3, window_bounds = array<i64: 8, 256>}, {pipeline_mode = #tpu.pipeline_mode<synchronous>, transform_indices = @transform_4, window_bounds = array<i64: 1, 256>}, {pipeline_mode = #tpu.pipeline_mode<synchronous>, transform_indices = @transform_5, window_bounds = array<i64: 256, 256>}, {pipeline_mode = #tpu.pipeline_mode<synchronous>, transform_indices = @transform_6, window_bounds = array<i64: 1, 256>}, {pipeline_mode = #tpu.pipeline_mode<synchronous>, transform_indices = @transform_7, window_bounds = array<i64: 1, 256>}, {pipeline_mode = #tpu.pipeline_mode<synchronous>, transform_indices = @transform_8, window_bounds = array<i64: 1, 1>}, {transform_indices = @transform_9, window_bounds = array<i64: 8, 128>}]} {
    %c0 = arith.constant 0 : index
    %c0_0 = arith.constant 0 : index
    %0 = vector.load %arg1[%c0, %c0_0] : memref<8x24xbf16, #tpu.memory_space<vmem>>, vector<8x24xbf16>
    %c0_1 = arith.constant 0 : index
    %c0_2 = arith.constant 0 : index
    %1 = vector.load %arg3[%c0_1, %c0_2] : memref<24x256xbf16, #tpu.memory_space<vmem>>, vector<24x256xbf16>
    %cst = arith.constant dense<0.000000e+00> : vector<8x256xf32>
    %2 = tpu.matmul %0, %1, %cst {dimension_numbers = #tpu.dot_dimension_numbers<[1], [0], [0], [1], [0, 0, 1, 1], [], []>} : vector<8x24xbf16>, vector<24x256xbf16>, vector<8x256xf32> -> vector<8x256xf32>
    %c0_3 = arith.constant 0 : index
    %c0_4 = arith.constant 0 : index
    %3 = vector.load %arg2[%c0_3, %c0_4] : memref<8x8xbf16, #tpu.memory_space<vmem>>, vector<8x8xbf16>
    %c0_5 = arith.constant 0 : index
    %c0_6 = arith.constant 0 : index
    %4 = vector.load %arg4[%c0_5, %c0_6] : memref<8x256xbf16, #tpu.memory_space<vmem>>, vector<8x256xbf16>
    %cst_7 = arith.constant dense<0.000000e+00> : vector<8x256xf32>
    %5 = tpu.matmul %3, %4, %cst_7 {dimension_numbers = #tpu.dot_dimension_numbers<[1], [0], [0], [1], [0, 0, 1, 1], [], []>} : vector<8x8xbf16>, vector<8x256xbf16>, vector<8x256xf32> -> vector<8x256xf32>
    %6 = arith.addf %2, %5 : vector<8x256xf32>
    %c0_8 = arith.constant 0 : index
    %c0_9 = arith.constant 0 : index
    %7 = vector.load %arg5[%c0_8, %c0_9] : memref<1x256xf32, #tpu.memory_space<vmem>>, vector<1x256xf32>
    %8 = vector.broadcast %7 : vector<1x256xf32> to vector<8x256xf32>
    %9 = arith.addf %6, %8 : vector<8x256xf32>
    %cst_10 = arith.constant 0.000000e+00 : f32
    %10 = vector.broadcast %cst_10 : f32 to vector<8x256xf32>
    %11 = arith.maximumf %9, %10 : vector<8x256xf32>
    %12 = arith.truncf %11 : vector<8x256xf32> to vector<8x256xbf16>
    %c0_11 = arith.constant 0 : index
    %c0_12 = arith.constant 0 : index
    %13 = vector.load %arg6[%c0_11, %c0_12] : memref<256x256xbf16, #tpu.memory_space<vmem>>, vector<256x256xbf16>
    %cst_13 = arith.constant dense<0.000000e+00> : vector<8x256xf32>
    %14 = tpu.matmul %12, %13, %cst_13 {dimension_numbers = #tpu.dot_dimension_numbers<[1], [0], [0], [1], [0, 0, 1, 1], [], []>} : vector<8x256xbf16>, vector<256x256xbf16>, vector<8x256xf32> -> vector<8x256xf32>
    %c0_14 = arith.constant 0 : index
    %c0_15 = arith.constant 0 : index
    %15 = vector.load %arg7[%c0_14, %c0_15] : memref<1x256xf32, #tpu.memory_space<vmem>>, vector<1x256xf32>
    %16 = vector.broadcast %15 : vector<1x256xf32> to vector<8x256xf32>
    %17 = arith.addf %14, %16 : vector<8x256xf32>
    %cst_16 = arith.constant 0.000000e+00 : f32
    %18 = vector.broadcast %cst_16 : f32 to vector<8x256xf32>
    %19 = arith.maximumf %17, %18 : vector<8x256xf32>
    %c0_17 = arith.constant 0 : index
    %c0_18 = arith.constant 0 : index
    %20 = vector.load %arg8[%c0_17, %c0_18] : memref<1x256xbf16, #tpu.memory_space<vmem>>, vector<1x256xbf16>
    %21 = arith.extf %20 : vector<1x256xbf16> to vector<1x256xf32>
    %22 = vector.broadcast %21 : vector<1x256xf32> to vector<8x256xf32>
    %23 = arith.mulf %19, %22 : vector<8x256xf32>
    %cst_19 = arith.constant dense<0.000000e+00> : vector<8xf32>
    %24 = vector.multi_reduction <add>, %23, %cst_19 [1] : vector<8x256xf32> to vector<8xf32>
    %25 = vector.shape_cast %24 : vector<8xf32> to vector<8x1xf32>
    %c0_20 = arith.constant 0 : index
    %c0_21 = arith.constant 0 : index
    %26 = vector.load %arg9[%c0_20, %c0_21] : memref<1x1xf32, #tpu.memory_space<vmem>>, vector<1x1xf32>
    %27 = vector.broadcast %26 : vector<1x1xf32> to vector<8x1xf32>
    %28 = arith.addf %25, %27 : vector<8x1xf32>
    %29 = vector.shape_cast %28 : vector<8x1xf32> to vector<8x1xf32>
    %30 = vector.broadcast %29 : vector<8x1xf32> to vector<8x128xf32>
    %c0_22 = arith.constant 0 : index
    %c0_23 = arith.constant 0 : index
    %31 = vector.load %arg10[%c0_22, %c0_23] : memref<8x128xf32, #tpu.memory_space<vmem>>, vector<8x128xf32>
    tpu.vector_store %arg10[%c0_22, %c0_23], %30 {strides = array<i32>} : memref<8x128xf32, #tpu.memory_space<vmem>>, vector<8x128xf32>,
    return
  }
  func.func @transform_0(%arg0: i32) -> (i32, i32) {
    %c0_i32 = arith.constant 0 : i32
    %c0_i32_0 = arith.constant 0 : i32
    return %arg0, %c0_i32 : i32, i32
  }
  func.func @transform_1(%arg0: i32) -> (i32, i32) {
    %c0_i32 = arith.constant 0 : i32
    %c0_i32_0 = arith.constant 0 : i32
    return %arg0, %c0_i32 : i32, i32
  }
  func.func @transform_2(%arg0: i32) -> (i32, i32) {
    %c0_i32 = arith.constant 0 : i32
    %c0_i32_0 = arith.constant 0 : i32
    %c0_i32_1 = arith.constant 0 : i32
    return %c0_i32, %c0_i32_0 : i32, i32
  }
  func.func @transform_3(%arg0: i32) -> (i32, i32) {
    %c0_i32 = arith.constant 0 : i32
    %c0_i32_0 = arith.constant 0 : i32
    %c0_i32_1 = arith.constant 0 : i32
    return %c0_i32, %c0_i32_0 : i32, i32
  }
  func.func @transform_4(%arg0: i32) -> (i32, i32) {
    %c0_i32 = arith.constant 0 : i32
    %c0_i32_0 = arith.constant 0 : i32
    %c0_i32_1 = arith.constant 0 : i32
    return %c0_i32, %c0_i32_0 : i32, i32
  }
  func.func @transform_5(%arg0: i32) -> (i32, i32) {
    %c0_i32 = arith.constant 0 : i32
    %c0_i32_0 = arith.constant 0 : i32
    %c0_i32_1 = arith.constant 0 : i32
    return %c0_i32, %c0_i32_0 : i32, i32
  }
  func.func @transform_6(%arg0: i32) -> (i32, i32) {
    %c0_i32 = arith.constant 0 : i32
    %c0_i32_0 = arith.constant 0 : i32
    %c0_i32_1 = arith.constant 0 : i32
    return %c0_i32, %c0_i32_0 : i32, i32
  }
  func.func @transform_7(%arg0: i32) -> (i32, i32) {
    %c0_i32 = arith.constant 0 : i32
    %c0_i32_0 = arith.constant 0 : i32
    %c0_i32_1 = arith.constant 0 : i32
    return %c0_i32, %c0_i32_0 : i32, i32
  }
  func.func @transform_8(%arg0: i32) -> (i32, i32) {
    %c0_i32 = arith.constant 0 : i32
    %c0_i32_0 = arith.constant 0 : i32
    %c0_i32_1 = arith.constant 0 : i32
    return %c0_i32, %c0_i32_0 : i32, i32
  }
  func.func @transform_9(%arg0: i32) -> (i32, i32) {
    %c0_i32 = arith.constant 0 : i32
    %c0_i32_0 = arith.constant 0 : i32
    return %arg0, %c0_i32 : i32, i32
  }
}

</mosaic_0001>

<bundles_post_ra>
// kernel: tpu_custom_call.1
= control target key start
LH: loop header
LB: loop body
LE: loop exit
PB: predicated region body
PF: predicated region fallthrough
CT: control target
= control target key end

     0   :  { %s858_s0 = inlined_call_operand.hbm [shape: bf16[8,24], index: 0, kind: input, shape index: {}]   ;;  %s859_s1 = inlined_call_operand.vmem [shape: bf16[8,8], index: 1, kind: input, shape index: {}]   ;;  %s860_s2 = inlined_call_operand.hbm [shape: bf16[24,256], index: 2, kind: input, shape index: {}]   ;;  %s861_s3 = inlined_call_operand.vmem [shape: bf16[8,256], index: 3, kind: input, shape index: {}]   ;;  %s862_s4 = inlined_call_operand.vmem [shape: f32[1,256], index: 4, kind: input, shape index: {}]   ;;  %s863_s5 = inlined_call_operand.hbm [shape: bf16[256,256], index: 5, kind: input, shape index: {}]   ;;  %s864_s6 = inlined_call_operand.vmem [shape: f32[1,256], index: 6, kind: input, shape index: {}]   ;;  %s865_s7 = inlined_call_operand.vmem [shape: bf16[1,256], index: 7, kind: input, shape index: {}]   ;;  %s866_s8 = inlined_call_operand.<no memory space> [shape: f32[1,1], index: 8, kind: input, shape index: {}]   ;;  %s867_s9 = inlined_call_operand.hbm [shape: f32[8,128], index: 9, kind: output, shape index: {}]  }
   0x1   :  { %v14_v0 = vstv %s866_s8 }
   0x2   :  { %15 = vst [vmem:[#allocation2] sm:$0x1] %v14_v0 }
   0x3   :  { %16 = vsyncpa [#allocation4], 0 }
   0x4   :  { %17 = vsyncpa [#allocation7], 0 }
   0x5   :  { %18 = vsyncpa [#allocation5], 0  ;;  %s725_s11 = smov [#allocation6]   ;;  %s631_s15 = scalar_lea.hbm %s860_s2, 384 }
   0x6   :  { %s36_s12 = sshll.u32 %s725_s11, 4  ;;  %p632_p0 = scmp.ne.s32.totalorder %s860_s2, %s631_s15  ;;  %s37_s12 = int_to_ptr.vmem [resolvable:$true] %s36_s12 }
   0x7   :  { %p635_p1 = scmp.lt.u32.totalorder %s631_s15, %s860_s2 }
   0x9   :  { %p637_p2 = pnand %p635_p1, %p632_p0 }
   0xb   :  { %640 = shalt.err (!%p637_p2)
}
   0xc   :  { %s641_s8 = scalar_lea.vmem %s37_s12, 384  ;;  %p646_p4 = scmp.lt.s32.totalorder %s37_s12, %s37_s12 }
   0xd   :  { %p642_p3 = scmp.ne.s32.totalorder %s37_s12, %s641_s8  ;;  %p647_p5 = scmp.lt.s32.totalorder %s641_s8, %s641_s8 }
   0xf   :  { %p648_p6 = por %p647_p5, %p646_p4 }
  0x11   :  { %p649_p7 = pnand %p648_p6, %p642_p3 }
  0x13   :  { %652 = shalt.err (!%p649_p7)
}
  0x14   :  { %s726_s20 = smov 128   ;;  %s727_s21 = smov 8  }
  0x15   :  { %42 = dma.hbm_to_vmem [thread:$0]  %s860_s2, 384, %s37_s12, [#allocation7], %s726_s20, %s726_s20, %s727_s21  }
  0x16   :  { %s728_s24 = smov [#allocation3]   ;;  %s729_s26 = smov [#allocation8]  }
  0x17   :  { %s25_s25 = sshll.u32 %s728_s24, 4  ;;  %s52_s27 = sshll.u32 %s729_s26, 4  ;;  %s26_s25 = int_to_ptr.vmem [resolvable:$true] %s25_s25  ;;  %s53_s27 = int_to_ptr.vmem [resolvable:$true] %s52_s27 }
  0x18   :  { %s653_s30 = scalar_lea.hbm %s858_s0, 64 }
  0x19   :  { %p654_p8 = scmp.ne.s32.totalorder %s858_s0, %s653_s30  ;;  %p657_p9 = scmp.lt.u32.totalorder %s653_s30, %s858_s0 }
  0x1b   :  { %p659_p10 = pnand %p657_p9, %p654_p8 }
  0x1d   :  { %662 = shalt.err (!%p659_p10)
}
  0x1e   :  { %s663_s2 = scalar_lea.vmem %s26_s25, 64  ;;  %p668_p12 = scmp.lt.s32.totalorder %s26_s25, %s26_s25 }
  0x1f   :  { %p664_p11 = scmp.ne.s32.totalorder %s26_s25, %s663_s2  ;;  %p669_p13 = scmp.lt.s32.totalorder %s663_s2, %s663_s2 }
  0x21   :  { %p670_p0 = por %p669_p13, %p668_p12 }
  0x23   :  { %p671_p1 = pnand %p670_p0, %p664_p11 }
  0x25   :  { %674 = shalt.err (!%p671_p1)
}
  0x26   :  { %28 = dma.hbm_to_vmem [thread:$0]  %s858_s0, 64, %s26_s25, [#allocation4]  }
  0x27   :  { %s675_s18 = scalar_lea.hbm %s863_s5, 4096 }
  0x28   :  { %p676_p2 = scmp.ne.s32.totalorder %s863_s5, %s675_s18  ;;  %p679_p3 = scmp.lt.u32.totalorder %s675_s18, %s863_s5 }
  0x2a   :  { %p681_p4 = pnand %p679_p3, %p676_p2 }
  0x2c   :  { %684 = shalt.err (!%p681_p4)
}
  0x2d   :  { %s685_s24 = scalar_lea.vmem %s53_s27, 4096  ;;  %p690_p6 = scmp.lt.s32.totalorder %s53_s27, %s53_s27 }
  0x2e   :  { %p686_p5 = scmp.ne.s32.totalorder %s53_s27, %s685_s24  ;;  %p691_p7 = scmp.lt.s32.totalorder %s685_s24, %s685_s24 }
  0x30   :  { %p692_p8 = por %p691_p7, %p690_p6 }
  0x32   :  { %p693_p9 = pnand %p692_p8, %p686_p5 }
  0x34   :  { %696 = shalt.err (!%p693_p9)
}
  0x35   :  { %58 = dma.hbm_to_vmem [thread:$0]  %s863_s5, 4096, %s53_s27, [#allocation7], %s726_s20, %s726_s20, %s727_s21  }
  0x36   :  { %719 = dma.done.wait [#allocation4], 64  }
  0x37   :  { %720 = vsyncadd [#allocation4], 4294967232 }
  0x38   :  { %721 = dma.done.wait [#allocation7], 4480  }
  0x39   :  { %722 = vsyncadd [#allocation7], 4294962816  ;;  %v730_v1 = vmov 0   ;;  %v80_v2 = vld [vmem:[%s861_s3] sm:$0xff]  ;;  %vm90_vm0 = vcmask 1043456   ;;  %v78_v8 = vld [vmem:[#allocation6 + $0x10] sm:$0xff]  ;;  %v206_v46 = vlaneseq }
  0x3a   :  { %129 = vmatprep.mubr.bf16.mxu1 %v730_v1  ;;  %575 = vset.pattern.permute.xlu0 %v730_v1  ;;  %v526_v3 = vcombine.high %v80_v2, %v80_v2  ;;  %v525_v4 = vcombine.low %v80_v2, %v80_v2  ;;  %v580_v5 = vld [vmem:[#allocation6 + $0x4] ss:$8 sps:$4 sm:$0xff]   ;;  %v79_v6 = vld [vmem:[%s859_s1] sm:$0xf]  ;;  %v578_v7 = vld [vmem:[#allocation6] ss:$8 sps:$4 sm:$0xff]   ;;  %v532_v13 = vcombine.high %v78_v8, %v78_v8 }
  0x3b   :  { %v583_v10 = vld [vmem:[#allocation8 + $0x4] ss:$8 sps:$4 sm:$0xff]   ;;  %v585_v11 = vld [vmem:[#allocation8] ss:$8 sps:$4 sm:$0xff]   ;;  %vm86_vm1 = vcmask 64512   ;;  %v531_v14 = vcombine.low %v78_v8, %v78_v8  ;;  %vm153_vm2 = vcmask 195584  }
  0x3c   :  { %527 = vmatprep.subr.msk.bf16.mxu1 %vm90_vm0, %v526_v3  ;;  %v92_v9 = vsel %vm90_vm0, %v525_v4, 0  ;;  %v586_v12 = vld [vmem:[#allocation8 + $0x14] ss:$8 sps:$4 sm:$0xff]   ;;  %426 = vmatprep.subr.bf16.mxu0 %v583_v10  ;;  %v588_v15 = vld [vmem:[#allocation8 + $0x10] ss:$8 sps:$4 sm:$0xff]   ;;  %v207_v47 = vshrl.u32 %v206_v46, 7 }
  0x3d   :  { %98 = vmatpush1.bf16.msra.mxu1 %v92_v9  ;;  %427 = vmatpush1.bf16.msra.mxu0 %v585_v11  ;;  %v589_v16 = vld [vmem:[#allocation8 + $0x24] ss:$8 sps:$4 sm:$0xff]   ;;  %v158_v17 = vsel %vm90_vm0, %v531_v14, 0  ;;  %v591_v18 = vld [vmem:[#allocation8 + $0x20] ss:$8 sps:$4 sm:$0xff]  }
  0x3e   :  { %163 = vmatprep.subr.bf16.mxu1 %v580_v5  ;;  %428 = vmatprep.subr.bf16.mxu0 %v586_v12  ;;  %v592_v19 = vld [vmem:[#allocation8 + $0x34] ss:$8 sps:$4 sm:$0xff]   ;;  %v75_v20 = vld [vmem:[#allocation3] sm:$0xf]  ;;  %v594_v21 = vld [vmem:[#allocation8 + $0x30] ss:$8 sps:$4 sm:$0xff]  }
  0x3f   :  { %v595_v22 = vld [vmem:[#allocation8 + $0x44] ss:$8 sps:$4 sm:$0xff]   ;;  %v597_v23 = vld [vmem:[#allocation8 + $0x40] ss:$8 sps:$4 sm:$0xff]   ;;  %v598_v24 = vld [vmem:[#allocation8 + $0x54] ss:$8 sps:$4 sm:$0xff]  }
  0x40   :  { %528 = vmatmul.mubr.msk.bf16.vlgmr.msra.gmra.mrb[0].mxu1 %vm86_vm1, %v79_v6  ;;  %v600_v25 = vld [vmem:[#allocation8 + $0x50] ss:$8 sps:$4 sm:$0xff]   ;;  %v601_v26 = vld [vmem:[#allocation8 + $0x64] ss:$8 sps:$4 sm:$0xff]   ;;  %v603_v27 = vld [vmem:[#allocation8 + $0x60] ss:$8 sps:$4 sm:$0xff]  }
  0x41   :  { %164 = vmatpush1.bf16.msra.mxu1 %v578_v7  ;;  %195 = vmatprep.mubr.bf16.mxu1 %v730_v1  ;;  %v604_v28 = vld [vmem:[#allocation8 + $0x74] ss:$8 sps:$4 sm:$0xff]   ;;  %v606_v29 = vld [vmem:[#allocation8 + $0x70] ss:$8 sps:$4 sm:$0xff]   ;;  %v607_v30 = vld [vmem:[#allocation8 + $0x84] ss:$8 sps:$4 sm:$0xff]  }
  0x42   :  { %533 = vmatprep.subr.msk.bf16.mxu1 %vm90_vm0, %v532_v13  ;;  %429 = vmatpush1.bf16.msra.mxu0 %v588_v15  ;;  %v609_v31 = vld [vmem:[#allocation8 + $0x80] ss:$8 sps:$4 sm:$0xff]   ;;  %v610_v32 = vld [vmem:[#allocation8 + $0x94] ss:$8 sps:$4 sm:$0xff]   ;;  %v612_v33 = vld [vmem:[#allocation8 + $0x90] ss:$8 sps:$4 sm:$0xff]  }
  0x43   :  { %430 = vmatprep.subr.bf16.mxu0 %v589_v16  ;;  %v613_v34 = vld [vmem:[#allocation8 + $0xa4] ss:$8 sps:$4 sm:$0xff]   ;;  %v615_v35 = vld [vmem:[#allocation8 + $0xa0] ss:$8 sps:$4 sm:$0xff]   ;;  %v616_v36 = vld [vmem:[#allocation8 + $0xb4] ss:$8 sps:$4 sm:$0xff]  }
  0x44   :  { %v618_v37 = vld [vmem:[#allocation8 + $0xb0] ss:$8 sps:$4 sm:$0xff]   ;;  %v619_v38 = vld [vmem:[#allocation8 + $0xc4] ss:$8 sps:$4 sm:$0xff]   ;;  %v621_v39 = vld [vmem:[#allocation8 + $0xc0] ss:$8 sps:$4 sm:$0xff]  }
  0x45   :  { %166 = vmatpush1.bf16.msra.mxu1 %v158_v17  ;;  %v622_v40 = vld [vmem:[#allocation8 + $0xd4] ss:$8 sps:$4 sm:$0xff]   ;;  %v624_v41 = vld [vmem:[#allocation8 + $0xd0] ss:$8 sps:$4 sm:$0xff]   ;;  %v625_v42 = vld [vmem:[#allocation8 + $0xe4] ss:$8 sps:$4 sm:$0xff]  }
  0x46   :  { %431 = vmatpush1.bf16.msra.mxu0 %v591_v18  ;;  %v627_v43 = vld [vmem:[#allocation8 + $0xe0] ss:$8 sps:$4 sm:$0xff]   ;;  %v628_v44 = vld [vmem:[#allocation8 + $0xf4] ss:$8 sps:$4 sm:$0xff]   ;;  %v630_v45 = vld [vmem:[#allocation8 + $0xf0] ss:$8 sps:$4 sm:$0xff]  }
  0x47   :  { %432 = vmatprep.subr.bf16.mxu0 %v592_v19  ;;  %v208_v52 = vsub.s32 0, %v207_v47  ;;  %v204_v53 = vld [vmem:[%s862_s4] sm:$0x3]  ;;  %v212_v54 = vsub.s32 1, %v207_v47  ;;  %v478_v8 = vsub.s32 2, %v207_v47 }
  0x48   :  { %534 = vmatmul.mubr.msk.bf16.vlgmr.msra.gmra.mrb[4].mxu1 %vm153_vm2, %v75_v20  ;;  %v469_v5 = vld [vmem:[%s865_s7] sm:$0x3] }
  0x49   :  { %v209_v55 = vrot.slane %v204_v53, %v208_v52  ;;  %v213_v57 = vrot.slane %v204_v53, %v212_v54  ;;  %v470_v6 = vunpack.c.l.bf16 %v469_v5  ;;  %v254_v7 = vld [vmem:[%s864_s6] sm:$0x3]  ;;  %s731_s6 = smov [#allocation9]  }
  0x4a   :  { %433 = vmatpush1.bf16.msra.mxu0 %v594_v21  ;;  %v259_v9 = vrot.slane %v254_v7, %v208_v52  ;;  %v263_v11 = vrot.slane %v254_v7, %v212_v54  ;;  %s515_s7 = sshll.u32 %s731_s6, 4  ;;  %s516_s7 = int_to_ptr.vmem [resolvable:$true] %s515_s7 }
  0x4b   :  { %434 = vmatprep.subr.bf16.mxu0 %v595_v22  ;;  %v475_v10 = vrot.slane %v470_v6, %v208_v52  ;;  %v479_v12 = vrot.slane %v470_v6, %v478_v8  ;;  %s697_s27 = scalar_lea.vmem %s516_s7, 128  ;;  %p702_p11 = scmp.lt.s32.totalorder %s516_s7, %s516_s7 }
  0x4c   :  { %p698_p10 = scmp.ne.s32.totalorder %s516_s7, %s697_s27  ;;  %p703_p12 = scmp.lt.s32.totalorder %s697_s27, %s697_s27 }
  0x4d   :  { %v485_v16 = vrot.slane %v475_v10, %v208_v52  ;;  %v489_v19 = vrot.slane %v479_v12, %v208_v52 }
  0x4e   :  { %435 = vmatpush1.bf16.msra.mxu0 %v597_v23  ;;  %p704_p13 = por %p703_p12, %p702_p11 }
  0x4f   :  { %436 = vmatprep.subr.bf16.mxu0 %v598_v24 }
  0x50   :  { %p705_p0 = pnand %p704_p13, %p698_p10 }
  0x52   :  { %437 = vmatpush1.bf16.msra.mxu0 %v600_v25 }
  0x53   :  { %438 = vmatprep.subr.bf16.mxu0 %v601_v26  ;;  %v567_v26 = vld [vmem:[#allocation2] ss:$0 sm:$0xff] }
  0x56   :  { %439 = vmatpush1.bf16.msra.mxu0 %v603_v27 }
  0x57   :  { %440 = vmatprep.subr.bf16.mxu0 %v604_v28 }
  0x5a   :  { %441 = vmatpush1.bf16.msra.mxu0 %v606_v29 }
  0x5b   :  { %442 = vmatprep.subr.bf16.mxu0 %v607_v30 }
  0x5e   :  { %443 = vmatpush1.bf16.msra.mxu0 %v609_v31 }
  0x5f   :  { %444 = vmatprep.subr.bf16.mxu0 %v610_v32 }
  0x62   :  { %445 = vmatpush1.bf16.msra.mxu0 %v612_v33 }
  0x63   :  { %446 = vmatprep.subr.bf16.mxu0 %v613_v34 }
  0x66   :  { %447 = vmatpush1.bf16.msra.mxu0 %v615_v35 }
  0x67   :  { %448 = vmatprep.subr.bf16.mxu0 %v616_v36 }
  0x6a   :  { %449 = vmatpush1.bf16.msra.mxu0 %v618_v37 }
  0x6b   :  { %450 = vmatprep.subr.bf16.mxu0 %v619_v38 }
  0x6e   :  { %451 = vmatpush1.bf16.msra.mxu0 %v621_v39 }
  0x6f   :  { %452 = vmatprep.subr.bf16.mxu0 %v622_v40 }
  0x72   :  { %453 = vmatpush1.bf16.msra.mxu0 %v624_v41 }
  0x73   :  { %454 = vmatprep.subr.bf16.mxu0 %v625_v42 }
  0x76   :  { %455 = vmatpush1.bf16.msra.mxu0 %v627_v43 }
  0x77   :  { %456 = vmatprep.subr.bf16.mxu0 %v628_v44 }
  0x7a   :  { %457 = vmatpush1.bf16.msra.mxu0 %v630_v45 }
 0x113   :  { %v131_v48 = vpop.f32.mrb[0].mxu1 }
 0x114   :  { %v133_v49 = vpop.f32.mrb[1].mxu1 }
 0x115   :  { %v135_v50 = vpop.f32.mrb[2].mxu1 }
 0x116   :  { %v136_v51 = vpop.f32.mrb[3].mxu1 }
 0x11b   :  { %v197_v56 = vpop.f32.mrb[4].mxu1 }
 0x11c   :  { %v198_v58 = vadd.f32 %v197_v56, %v131_v48  ;;  %v199_v59 = vpop.f32.mrb[5].mxu1 }
 0x11d   :  { %v200_v60 = vadd.f32 %v199_v59, %v133_v49  ;;  %v201_v61 = vpop.f32.mrb[6].mxu1 }
 0x11e   :  { %v216_v62 = vadd.f32 %v209_v55, %v198_v58  ;;  %v202_v63 = vpop.f32.mrb[7].mxu1 }
 0x11f   :  { %v217_v0 = vadd.f32 %v213_v57, %v200_v60 }
 0x120   :  { %v218_v1 = vmax.f32 %v216_v62, 0.0 }
 0x121   :  { %v219_v2 = vmax.f32 %v217_v0, 0.0 }
 0x122   :  { %v220_v4 = vpack.c.bf16 %v218_v1, %v218_v1 }
 0x123   :  { %v221_v3 = vpack.c.bf16 %v219_v2, %v219_v2 }
 0x125   :  { %458 = vmatprep.mubr.bf16.mxu0 %v221_v3 }
 0x126   :  { %459 = vmatmul.mubr.bf16.vlgmr.msra.gmra.mrb[0].mxu0 %v220_v4 }
 0x1f9   :  { %v460_v13 = vpop.f32.mrb[0].mxu0 }
 0x1fa   :  { %v461_v14 = vadd.f32 %v460_v13, %v259_v9  ;;  %v462_v15 = vpop.f32.mrb[1].mxu0 }
 0x1fb   :  { %v463_v17 = vadd.f32 %v462_v15, %v263_v11  ;;  %v464_v18 = vpop.f32.mrb[2].mxu0 }
 0x1fc   :  { %v467_v20 = vmax.f32 %v461_v14, 0.0  ;;  %v465_v21 = vpop.f32.mrb[3].mxu0 }
 0x1fd   :  { %v468_v22 = vmax.f32 %v463_v17, 0.0 }
 0x1fe   :  { %v490_v23 = vmul.f32 %v485_v16, %v467_v20 }
 0x1ff   :  { %v491_v24 = vmul.f32 %v489_v19, %v468_v22 }
 0x201   :  { %v492_v25 = vadd.f32 %v491_v24, %v490_v23 }
 0x203   :  { %493 = vadd.xlane.f32.xlu0 %v492_v25 }
 0x290   :  { %v494_v27 = vpop.xlane.xlu0 %493 }
 0x291   :  { %v502_v28 = vadd.f32 %v567_v26, %v494_v27 }
 0x293   :  { %505 = vperm.xlu0 %575, %v502_v28  }
 0x312   :  { %v506_v29 = vpop.permute.xlu0 %505 }
 0x313   :  { %508 = vst [vmem:[#allocation9] sm:$0xff] %v506_v29 }
 0x314   :  { %708 = shalt.err (!%p705_p0)
}
 0x315   :  { %s709_s13 = scalar_lea.hbm %s867_s9, 128 }
 0x316   :  { %p710_p1 = scmp.ne.s32.totalorder %s867_s9, %s709_s13  ;;  %p713_p2 = scmp.lt.u32.totalorder %s709_s13, %s867_s9 }
 0x318   :  { %p715_p3 = pnand %p713_p2, %p710_p1 }
 0x31a   :  { %718 = shalt.err (!%p715_p3)
}
 0x31b   :  { %518 = dma.vmem_to_hbm [thread:$0]  %s516_s7, 128, %s867_s9, [#allocation5]  }
 0x31c   :  { %723 = dma.done.wait [#allocation5], 128  }
 0x31d   :  { %724 = vsyncadd [#allocation5], 4294967168 }
 0x31e   :  { %522 = vsyncpa [#allocation4], 1 }
 0x31f   :  { %523 = vsyncpa [#allocation7], 1 }
 0x320   :  { %524 = vsyncpa [#allocation5], 1 }

</bundles_post_ra>
